<compile_context>
chip_gen: v5e
topology: v5e:2x2
jax: 0.10.0
libtpu: 0.0.40
codegen_flags: <defaults>
</compile_context>

<pallas_src>
import functools

import jax
import jax.numpy as jnp
from jax import lax
from jax.experimental import pallas as pl
from jax.experimental.pallas import tpu as pltpu


def _round_up(x, m):
    return ((x + m - 1) // m) * m


def _pick_tile(n, pref):
    """Largest tile <= pref that divides n and is a multiple of 8 (else n)."""
    if n <= pref:
        return n
    for t in range(pref, 7, -1):
        if t % 8 == 0 and n % t == 0:
            return t
    return n  # full-extent block is always legal


# --------------------------------------------------------------------------- #
# Kernel 1: tiled Linear embeddings (one row block per grid step).
# --------------------------------------------------------------------------- #
def _embed_kernel(fs_ref, ft_ref, ws_ref, bs_ref, wt_ref, bt_ref, s_ref, t_ref):
    # Inputs go to the MXU in their native dtype; accumulate in f32.
    s = jnp.dot(fs_ref[...], ws_ref[...], preferred_element_type=jnp.float32)
    t = jnp.dot(ft_ref[...], wt_ref[...], preferred_element_type=jnp.float32)
    s_ref[...] = (s + bs_ref[...].astype(jnp.float32)).astype(s_ref.dtype)
    t_ref[...] = (t + bt_ref[...].astype(jnp.float32)).astype(t_ref.dtype)


# --------------------------------------------------------------------------- #
# Kernel 2: tiled pairwise (uniformity) + fused align loss.
# Grid = (row blocks, col blocks); col axis is the inner (streaming) axis.
# --------------------------------------------------------------------------- #
def _pairwise_kernel(s_row_ref, t_row_ref, s_col_ref, t_col_ref, out_ref,
                     es_acc, et_acc, al_acc,
                     *, n, align_alpha, unif_t, align_w, unif_w):
    i = pl.program_id(0)
    j = pl.program_id(1)
    ni = pl.num_programs(0)
    nj = pl.num_programs(1)

    @pl.when(jnp.logical_and(i == 0, j == 0))
    def _init():
        es_acc[...] = jnp.zeros_like(es_acc)
        et_acc[...] = jnp.zeros_like(et_acc)
        al_acc[...] = jnp.zeros_like(al_acc)

    s_row = s_row_ref[...]           # (TM, D)  resident across the inner j loop
    t_row = t_row_ref[...]
    s_col = s_col_ref[...]           # (TN, D)  streamed per j
    t_col = t_col_ref[...]

    dn = (((1,), (1,)), ((), ()))    # contract on the feature axis; no transpose

    # Interleave s / t streams: both Grams on the MXU, then both exps on the EUP.
    g_s = lax.dot_general(s_row, s_col, dn, preferred_element_type=jnp.float32)
    g_t = lax.dot_general(t_row, t_col, dn, preferred_element_type=jnp.float32)

    ones = jnp.ones((1, s_col.shape[1]), jnp.float32)
    s_col_sq = lax.dot_general(ones, s_col * s_col, dn,
                               preferred_element_type=jnp.float32)   # (1, TN)
    t_col_sq = lax.dot_general(ones, t_col * t_col, dn,
                               preferred_element_type=jnp.float32)   # (1, TN)
    s_row_sq = jnp.sum(s_row * s_row, axis=1, keepdims=True)          # (TM, 1)
    t_row_sq = jnp.sum(t_row * t_row, axis=1, keepdims=True)          # (TM, 1)

    d2_s = jnp.maximum(s_row_sq + s_col_sq - 2.0 * g_s, 0.0)          # (TM, TN)
    d2_t = jnp.maximum(t_row_sq + t_col_sq - 2.0 * g_t, 0.0)

    # No off-diagonal mask: the i == j diagonal contributes exp(0) == 1 per
    # row, i.e. exactly n over the whole grid, subtracted in the finalize step.
    es_acc[...] += jnp.exp(-unif_t * d2_s)
    et_acc[...] += jnp.exp(-unif_t * d2_t)

    # Align term fused into the first column pass (row tiles already resident).
    @pl.when(j == 0)
    def _align():
        diff = s_row - t_row
        nsq = jnp.sum(diff * diff, axis=1, keepdims=True)             # (TM, 1)
        if align_alpha == 2:
            per = nsq
        else:
            per = jnp.power(jnp.maximum(nsq, 0.0), 0.5 * align_alpha)
        al_acc[...] += per

    @pl.when(jnp.logical_and(i == ni - 1, j == nj - 1))
    def _finalize():
        pair_denom = float(n) * float(n - 1)
        sum_es = jnp.sum(es_acc[...]) - float(n)
        sum_et = jnp.sum(et_acc[...]) - float(n)
        unif_loss = 0.5 * (jnp.log(sum_es / pair_denom)
                           + jnp.log(sum_et / pair_denom))
        align_loss = jnp.sum(al_acc[...]) / float(n)
        out_ref[0, 0] = align_w * align_loss + unif_w * unif_loss


# --------------------------------------------------------------------------- #
# Wrapper
# --------------------------------------------------------------------------- #
def align_uniform_loss(feat_s, feat_t, w_s, b_s, w_t, b_t,
                       align_alpha=2, unif_t=2.0, align_w=1.0, unif_w=1.0):
    n, c_in = feat_s.shape
    d = w_s.shape[1]
    assert n >= 2, "uniformity loss needs at least 2 samples"

    # Pad the embedding dim to a lane-dense multiple of 128 (zeros are exact).
    d_pad = _round_up(d, 128)
    if d_pad != d:
        pad = ((0, 0), (0, d_pad - d))
        w_s = jnp.pad(w_s, pad)
        w_t = jnp.pad(w_t, pad)
        b_s = jnp.pad(b_s, pad)
        b_t = jnp.pad(b_t, pad)

    # ---- Kernel 1: embeddings -------------------------------------------- #
    tile_e = _pick_tile(n, 256)
    s, t = pl.pallas_call(
        _embed_kernel,
        out_shape=(jax.ShapeDtypeStruct((n, d_pad), jnp.float32),
                   jax.ShapeDtypeStruct((n, d_pad), jnp.float32)),
        grid_spec=pltpu.PrefetchScalarGridSpec(
            num_scalar_prefetch=0,
            grid=(n // tile_e,),
            in_specs=[
                pl.BlockSpec((tile_e, c_in), lambda i: (i, 0)),
                pl.BlockSpec((tile_e, c_in), lambda i: (i, 0)),
                pl.BlockSpec((c_in, d_pad), lambda i: (0, 0)),
                pl.BlockSpec((1, d_pad), lambda i: (0, 0)),
                pl.BlockSpec((c_in, d_pad), lambda i: (0, 0)),
                pl.BlockSpec((1, d_pad), lambda i: (0, 0)),
            ],
            out_specs=(pl.BlockSpec((tile_e, d_pad), lambda i: (i, 0)),
                       pl.BlockSpec((tile_e, d_pad), lambda i: (i, 0))),
        ),
        compiler_params=pltpu.CompilerParams(
            dimension_semantics=("parallel",)),
    )(feat_s, feat_t, w_s, b_s, w_t, b_t)

    # ---- Kernel 2: pairwise + align --------------------------------------- #
    tile = _pick_tile(n, 256)
    grid = (n // tile, n // tile)
    kernel = functools.partial(
        _pairwise_kernel,
        n=n, align_alpha=align_alpha, unif_t=float(unif_t),
        align_w=float(align_w), unif_w=float(unif_w),
    )
    cost = pl.CostEstimate(
        flops=int(4 * n * n * d_pad + 12 * n * n),
        transcendentals=int(2 * n * n),
        bytes_accessed=int(2 * n * d_pad * 4 * (grid[0] + 1) + 4),
    )
    out = pl.pallas_call(
        kernel,
        out_shape=jax.ShapeDtypeStruct((1, 1), jnp.float32),
        grid_spec=pltpu.PrefetchScalarGridSpec(
            num_scalar_prefetch=0,
            grid=grid,
            in_specs=[
                pl.BlockSpec((tile, d_pad), lambda i, j: (i, 0)),  # s row tile
                pl.BlockSpec((tile, d_pad), lambda i, j: (i, 0)),  # t row tile
                pl.BlockSpec((tile, d_pad), lambda i, j: (j, 0)),  # s col tile
                pl.BlockSpec((tile, d_pad), lambda i, j: (j, 0)),  # t col tile
            ],
            out_specs=pl.BlockSpec((1, 1), lambda i, j: (0, 0)),
            scratch_shapes=[
                pltpu.VMEM((tile, tile), jnp.float32),   # exp-sum acc for s
                pltpu.VMEM((tile, tile), jnp.float32),   # exp-sum acc for t
                pltpu.VMEM((tile, 1), jnp.float32),      # align acc
            ],
        ),
        # Accumulators are shared across the whole grid, so both axes must be
        # "arbitrary" for correctness (v7x megacore would need per-core partial
        # accumulators to mark the row axis "parallel").
        compiler_params=pltpu.CompilerParams(
            dimension_semantics=("arbitrary", "arbitrary")),
        cost_estimate=cost,
    )(s, t, s, t)
    return out[0, 0]


# --------------------------------------------------------------------------- #
# Pure-JAX reference (matches the PyTorch module).
# --------------------------------------------------------------------------- #
def _reference_loss(feat_s, feat_t, w_s, b_s, w_t, b_t,
                    align_alpha, unif_t, align_w, unif_w):
    s = feat_s @ w_s + b_s
    t = feat_t @ w_t + b_t
    align = jnp.mean(jnp.sum((s - t) ** 2, axis=1) ** (align_alpha / 2.0))

    def unif(x):
        n = x.shape[0]
        d2 = jnp.sum((x[:, None, :] - x[None, :, :]) ** 2, axis=-1)
        iu = jnp.triu_indices(n, k=1)
        return jnp.log(jnp.mean(jnp.exp(-unif_t * d2[iu])))

    return align_w * align + unif_w * 0.5 * (unif(s) + unif(t))


if __name__ == "__main__":
    N, C_IN, D = 64, 32, 32
    key = jax.random.PRNGKey(0)
    k1, k2, k3, k4, k5, k6 = jax.random.split(key, 6)

    feat_s = jax.random.normal(k1, (N, C_IN), jnp.float32)
    feat_t = jax.random.normal(k2, (N, C_IN), jnp.float32)

    # Deterministic synthetic parameters for embed_s / embed_t (Linear layers).
    w_s = jax.random.normal(k3, (C_IN, D), jnp.float32) * 0.05
    b_s = jax.random.normal(k4, (1, D), jnp.float32) * 0.01
    w_t = jax.random.normal(k5, (C_IN, D), jnp.float32) * 0.05
    b_t = jax.random.normal(k6, (1, D), jnp.float32) * 0.01

    loss = align_uniform_loss(
        feat_s, feat_t, w_s, b_s, w_t, b_t,
        align_alpha=2, unif_t=2.0, align_w=1.0, unif_w=1.0,
    )
    loss = jax.block_until_ready(loss)

    ref = _reference_loss(
        feat_s, feat_t, w_s, b_s, w_t, b_t,
        align_alpha=2, unif_t=2.0, align_w=1.0, unif_w=1.0,
    )
    ref = jax.block_until_ready(ref)

    assert loss.shape == () and jnp.isfinite(loss)
    assert abs(float(loss) - float(ref)) < 0.2, (float(loss), float(ref))
    print("KERNEL_OK")
</pallas_src>

<mosaic_0001>
module attributes {stable_mosaic.version = 11 : i64} {
  func.func @_embed_kernel(%arg0: i32, %arg1: memref<64x32xf32, #tpu.memory_space<vmem>>, %arg2: memref<64x32xf32, #tpu.memory_space<vmem>>, %arg3: memref<32x128xf32, #tpu.memory_space<vmem>>, %arg4: memref<1x128xf32, #tpu.memory_space<vmem>>, %arg5: memref<32x128xf32, #tpu.memory_space<vmem>>, %arg6: memref<1x128xf32, #tpu.memory_space<vmem>>, %arg7: memref<64x128xf32, #tpu.memory_space<vmem>>, %arg8: memref<64x128xf32, #tpu.memory_space<vmem>>) attributes {dimension_semantics = [#tpu.dimension_semantics<parallel>], iteration_bounds = array<i64: 1>, scalar_prefetch = 0 : i64, scratch_operands = 0 : i64, tpu.core_type = #tpu.core_type<tc>, window_params = [{transform_indices = @transform_0, window_bounds = array<i64: 64, 32>}, {transform_indices = @transform_1, window_bounds = array<i64: 64, 32>}, {pipeline_mode = #tpu.pipeline_mode<synchronous>, transform_indices = @transform_2, window_bounds = array<i64: 32, 128>}, {pipeline_mode = #tpu.pipeline_mode<synchronous>, transform_indices = @transform_3, window_bounds = array<i64: 1, 128>}, {pipeline_mode = #tpu.pipeline_mode<synchronous>, transform_indices = @transform_4, window_bounds = array<i64: 32, 128>}, {pipeline_mode = #tpu.pipeline_mode<synchronous>, transform_indices = @transform_5, window_bounds = array<i64: 1, 128>}, {transform_indices = @transform_6, window_bounds = array<i64: 64, 128>}, {transform_indices = @transform_7, window_bounds = array<i64: 64, 128>}]} {
    %c0 = arith.constant 0 : index
    %c0_0 = arith.constant 0 : index
    %0 = vector.load %arg1[%c0, %c0_0] : memref<64x32xf32, #tpu.memory_space<vmem>>, vector<64x32xf32>
    %c0_1 = arith.constant 0 : index
    %c0_2 = arith.constant 0 : index
    %1 = vector.load %arg3[%c0_1, %c0_2] : memref<32x128xf32, #tpu.memory_space<vmem>>, vector<32x128xf32>
    %cst = arith.constant dense<0.000000e+00> : vector<64x128xf32>
    %2 = tpu.matmul %0, %1, %cst {dimension_numbers = #tpu.dot_dimension_numbers<[1], [0], [0], [1], [0, 0, 1, 1], [], []>} : vector<64x32xf32>, vector<32x128xf32>, vector<64x128xf32> -> vector<64x128xf32>
    %c0_3 = arith.constant 0 : index
    %c0_4 = arith.constant 0 : index
    %3 = vector.load %arg2[%c0_3, %c0_4] : memref<64x32xf32, #tpu.memory_space<vmem>>, vector<64x32xf32>
    %c0_5 = arith.constant 0 : index
    %c0_6 = arith.constant 0 : index
    %4 = vector.load %arg5[%c0_5, %c0_6] : memref<32x128xf32, #tpu.memory_space<vmem>>, vector<32x128xf32>
    %cst_7 = arith.constant dense<0.000000e+00> : vector<64x128xf32>
    %5 = tpu.matmul %3, %4, %cst_7 {dimension_numbers = #tpu.dot_dimension_numbers<[1], [0], [0], [1], [0, 0, 1, 1], [], []>} : vector<64x32xf32>, vector<32x128xf32>, vector<64x128xf32> -> vector<64x128xf32>
    %c0_8 = arith.constant 0 : index
    %c0_9 = arith.constant 0 : index
    %6 = vector.load %arg4[%c0_8, %c0_9] : memref<1x128xf32, #tpu.memory_space<vmem>>, vector<1x128xf32>
    %7 = vector.broadcast %6 : vector<1x128xf32> to vector<64x128xf32>
    %8 = arith.addf %2, %7 : vector<64x128xf32>
    %c0_10 = arith.constant 0 : index
    %c0_11 = arith.constant 0 : index
    %9 = vector.load %arg7[%c0_10, %c0_11] : memref<64x128xf32, #tpu.memory_space<vmem>>, vector<64x128xf32>
    tpu.vector_store %arg7[%c0_10, %c0_11], %8 {strides = array<i32>} : memref<64x128xf32, #tpu.memory_space<vmem>>, vector<64x128xf32>,
    %c0_12 = arith.constant 0 : index
    %c0_13 = arith.constant 0 : index
    %10 = vector.load %arg6[%c0_12, %c0_13] : memref<1x128xf32, #tpu.memory_space<vmem>>, vector<1x128xf32>
    %11 = vector.broadcast %10 : vector<1x128xf32> to vector<64x128xf32>
    %12 = arith.addf %5, %11 : vector<64x128xf32>
    %c0_14 = arith.constant 0 : index
    %c0_15 = arith.constant 0 : index
    %13 = vector.load %arg8[%c0_14, %c0_15] : memref<64x128xf32, #tpu.memory_space<vmem>>, vector<64x128xf32>
    tpu.vector_store %arg8[%c0_14, %c0_15], %12 {strides = array<i32>} : memref<64x128xf32, #tpu.memory_space<vmem>>, vector<64x128xf32>,
    return
  }
  func.func @transform_0(%arg0: i32) -> (i32, i32) {
    %c0_i32 = arith.constant 0 : i32
    %c0_i32_0 = arith.constant 0 : i32
    return %arg0, %c0_i32 : i32, i32
  }
  func.func @transform_1(%arg0: i32) -> (i32, i32) {
    %c0_i32 = arith.constant 0 : i32
    %c0_i32_0 = arith.constant 0 : i32
    return %arg0, %c0_i32 : i32, i32
  }
  func.func @transform_2(%arg0: i32) -> (i32, i32) {
    %c0_i32 = arith.constant 0 : i32
    %c0_i32_0 = arith.constant 0 : i32
    %c0_i32_1 = arith.constant 0 : i32
    return %c0_i32, %c0_i32_0 : i32, i32
  }
  func.func @transform_3(%arg0: i32) -> (i32, i32) {
    %c0_i32 = arith.constant 0 : i32
    %c0_i32_0 = arith.constant 0 : i32
    %c0_i32_1 = arith.constant 0 : i32
    return %c0_i32, %c0_i32_0 : i32, i32
  }
  func.func @transform_4(%arg0: i32) -> (i32, i32) {
    %c0_i32 = arith.constant 0 : i32
    %c0_i32_0 = arith.constant 0 : i32
    %c0_i32_1 = arith.constant 0 : i32
    return %c0_i32, %c0_i32_0 : i32, i32
  }
  func.func @transform_5(%arg0: i32) -> (i32, i32) {
    %c0_i32 = arith.constant 0 : i32
    %c0_i32_0 = arith.constant 0 : i32
    %c0_i32_1 = arith.constant 0 : i32
    return %c0_i32, %c0_i32_0 : i32, i32
  }
  func.func @transform_6(%arg0: i32) -> (i32, i32) {
    %c0_i32 = arith.constant 0 : i32
    %c0_i32_0 = arith.constant 0 : i32
    return %arg0, %c0_i32 : i32, i32
  }
  func.func @transform_7(%arg0: i32) -> (i32, i32) {
    %c0_i32 = arith.constant 0 : i32
    %c0_i32_0 = arith.constant 0 : i32
    return %arg0, %c0_i32 : i32, i32
  }
}

</mosaic_0001>

<bundles_post_ra>
// kernel: tpu_custom_call.1
= control target key start
LH: loop header
LB: loop body
LE: loop exit
PB: predicated region body
PF: predicated region fallthrough
CT: control target
= control target key end

     0   :  { %13 = vsyncpa [#allocation3], 0  ;;  %vm55_vm0 = vcmask 261120   ;;  %s468_s0 = inlined_call_operand.vmem [shape: f32[64,32], index: 0, kind: input, shape index: {}]   ;;  %s469_s1 = inlined_call_operand.vmem [shape: f32[64,32], index: 1, kind: input, shape index: {}]   ;;  %s470_s2 = inlined_call_operand.vmem [shape: f32[32,128], index: 2, kind: input, shape index: {}]   ;;  %s471_s3 = inlined_call_operand.vmem [shape: f32[1,128], index: 3, kind: input, shape index: {}]   ;;  %s472_s4 = inlined_call_operand.vmem [shape: f32[32,128], index: 4, kind: input, shape index: {}]   ;;  %s473_s5 = inlined_call_operand.vmem [shape: f32[1,128], index: 5, kind: input, shape index: {}]   ;;  %s474_s6 = inlined_call_operand.hbm [shape: f32[64,128], index: 6, kind: output, shape index: {0}]   ;;  %s475_s7 = inlined_call_operand.hbm [shape: f32[64,128], index: 7, kind: output, shape index: {1}]  }
   0x1   :  { %v38_v0 = vld [vmem:[%s470_s2 + $0x18] sm:$0xff]  ;;  %v37_v2 = vld [vmem:[%s470_s2 + $0x10] sm:$0xff]  ;;  %v36_v4 = vld [vmem:[%s470_s2 + $0x8] sm:$0xff] }
   0x2   :  { %v50_v1 = vld [vmem:[%s472_s4 + $0x18] sm:$0xff]  ;;  %258 = vmatpush.msra.mxu2 %v38_v0  ;;  %v49_v3 = vld [vmem:[%s472_s4 + $0x10] sm:$0xff]  ;;  %v48_v5 = vld [vmem:[%s472_s4 + $0x8] sm:$0xff]  ;;  %92 = vmatpush.msra.mxu0 %v38_v0 }
   0x3   :  { %262 = vmatpush.msra.mxu3 %v50_v1  ;;  %169 = vmatpush.msra.mxu1 %v50_v1  ;;  %v35_v6 = vld [vmem:[%s470_s2] sm:$0xff] }
   0x4   :  { %259 = vmatpush.msra.mxu2 %v37_v2  ;;  %v47_v7 = vld [vmem:[%s472_s4] sm:$0xff]  ;;  %93 = vmatpush.msra.mxu0 %v37_v2 }
   0x5   :  { %263 = vmatpush.msra.mxu3 %v49_v3  ;;  %170 = vmatpush.msra.mxu1 %v49_v3  ;;  %v31_v8 = vld [vmem:[%s468_s0 + $0x20] sm:$0xff] }
   0x6   :  { %260 = vmatpush.msra.mxu2 %v36_v4  ;;  %v43_v9 = vld [vmem:[%s469_s1 + $0x20] sm:$0xff]  ;;  %94 = vmatpush.msra.mxu0 %v36_v4 }
   0x7   :  { %264 = vmatpush.msra.mxu3 %v48_v5  ;;  %171 = vmatpush.msra.mxu1 %v48_v5  ;;  %v27_v10 = vld [vmem:[%s468_s0] sm:$0xff] }
   0x8   :  { %261 = vmatpush.msra.mxu2 %v35_v6  ;;  %v39_v11 = vld [vmem:[%s469_s1] sm:$0xff]  ;;  %95 = vmatpush.msra.mxu0 %v35_v6 }
   0x9   :  { %265 = vmatpush.msra.mxu3 %v47_v7  ;;  %246 = vmatmul.msk.f32.vlgmr.msra.gmra.mxu2 %vm55_vm0, %v31_v8 }
   0xa   :  { %254 = vmatmul.msk.f32.vlgmr.msra.gmra.mxu3 %vm55_vm0, %v43_v9  ;;  %172 = vmatpush.msra.mxu1 %v47_v7 }
   0xb   :  { %14 = vsyncpa [#allocation5], 0  ;;  %242 = vmatmul.msk.f32.vlgmr.msra.gmra.mxu0 %vm55_vm0, %v27_v10  ;;  %250 = vmatmul.msk.f32.vlgmr.msra.gmra.mxu1 %vm55_vm0, %v39_v11  ;;  %v32_v12 = vld [vmem:[%s468_s0 + $0x28] sm:$0xff]  ;;  %v33_v16 = vld [vmem:[%s468_s0 + $0x30] sm:$0xff]  ;;  %s212_s26 = sshll.u32 %s474_s6, 4  ;;  %s325_s27 = smov [#allocation4]   ;;  %s213_s26 = int_to_ptr.hbm [resolvable:$true] %s212_s26 }
   0xc   :  { %v44_v13 = vld [vmem:[%s469_s1 + $0x28] sm:$0xff]  ;;  %v45_v17 = vld [vmem:[%s469_s1 + $0x30] sm:$0xff]  ;;  %v34_v20 = vld [vmem:[%s468_s0 + $0x38] sm:$0xff]  ;;  %s223_s28 = sshll.u32 %s325_s27, 4  ;;  %s225_s8 = sshll.u32 %s475_s7, 4  ;;  %s224_s28 = int_to_ptr.vmem [resolvable:$true] %s223_s28  ;;  %s226_s8 = int_to_ptr.hbm [resolvable:$true] %s225_s8 }
   0xd   :  { %v28_v14 = vld [vmem:[%s468_s0 + $0x8] sm:$0xff]  ;;  %v29_v18 = vld [vmem:[%s468_s0 + $0x10] sm:$0xff]  ;;  %v46_v21 = vld [vmem:[%s469_s1 + $0x38] sm:$0xff]  ;;  %s326_s9 = smov 128   ;;  %s327_s6 = smov 8  }
   0xe   :  { %v40_v15 = vld [vmem:[%s469_s1 + $0x8] sm:$0xff]  ;;  %v41_v19 = vld [vmem:[%s469_s1 + $0x10] sm:$0xff]  ;;  %v30_v22 = vld [vmem:[%s468_s0 + $0x18] sm:$0xff]  ;;  %s324_s0 = smov [#allocation2]  }
   0xf   :  { %v42_v23 = vld [vmem:[%s469_s1 + $0x18] sm:$0xff]  ;;  %v270_v24 = vld [vmem:[%s471_s3] ss:$0 sm:$0xff]  ;;  %s210_s1 = sshll.u32 %s324_s0, 4  ;;  %s211_s1 = int_to_ptr.vmem [resolvable:$true] %s210_s1 }
  0x10   :  { %v271_v25 = vld [vmem:[%s473_s5] ss:$0 sm:$0xff] }
  0x11   :  { %247 = vmatmul.msk.f32.gmra.mxu2 %vm55_vm0, %v32_v12 }
  0x12   :  { %255 = vmatmul.msk.f32.gmra.mxu3 %vm55_vm0, %v44_v13 }
  0x13   :  { %243 = vmatmul.msk.f32.gmra.mxu0 %vm55_vm0, %v28_v14  ;;  %251 = vmatmul.msk.f32.gmra.mxu1 %vm55_vm0, %v40_v15 }
  0x19   :  { %248 = vmatmul.msk.f32.gmra.mxu2 %vm55_vm0, %v33_v16 }
  0x1a   :  { %256 = vmatmul.msk.f32.gmra.mxu3 %vm55_vm0, %v45_v17 }
  0x1b   :  { %244 = vmatmul.msk.f32.gmra.mxu0 %vm55_vm0, %v29_v18  ;;  %252 = vmatmul.msk.f32.gmra.mxu1 %vm55_vm0, %v41_v19 }
  0x21   :  { %249 = vmatmul.msk.f32.gmra.mxu2 %vm55_vm0, %v34_v20 }
  0x22   :  { %257 = vmatmul.msk.f32.gmra.mxu3 %vm55_vm0, %v46_v21 }
  0x23   :  { %245 = vmatmul.msk.f32.gmra.mxu0 %vm55_vm0, %v30_v22  ;;  %253 = vmatmul.msk.f32.gmra.mxu1 %vm55_vm0, %v42_v23 }
  0x88   :  { %v97_v26 = vpop.f32.mrf.mxu0  ;;  %v174_v27 = vpop.f32.mrf.mxu1 }
  0x89   :  { %v98_v28 = vadd.f32 %v270_v24, %v97_v26  ;;  %v175_v29 = vadd.f32 %v271_v25, %v174_v27 }
  0x8b   :  { %121 = vst [vmem:[#allocation2] sm:$0xff] %v98_v28 }
  0x8c   :  { %v109_v30 = vpop.f32.mrf.mxu2  ;;  %198 = vst [vmem:[#allocation4] sm:$0xff] %v175_v29 }
  0x8d   :  { %v186_v31 = vpop.f32.mrf.mxu3  ;;  %v110_v32 = vadd.f32 %v270_v24, %v109_v30 }
  0x8e   :  { %v187_v33 = vadd.f32 %v271_v25, %v186_v31 }
  0x8f   :  { %125 = vst [vmem:[#allocation2 + $0x20] sm:$0xff] %v110_v32 }
  0x90   :  { %202 = vst [vmem:[#allocation4 + $0x20] sm:$0xff] %v187_v33  ;;  %v100_v34 = vpop.f32.mrf.mxu0  ;;  %v177_v35 = vpop.f32.mrf.mxu1 }
  0x91   :  { %v101_v36 = vadd.f32 %v270_v24, %v100_v34  ;;  %v178_v37 = vadd.f32 %v271_v25, %v177_v35 }
  0x93   :  { %122 = vst [vmem:[#allocation2 + $0x8] sm:$0xff] %v101_v36 }
  0x94   :  { %v112_v38 = vpop.f32.mrf.mxu2  ;;  %199 = vst [vmem:[#allocation4 + $0x8] sm:$0xff] %v178_v37 }
  0x95   :  { %v189_v39 = vpop.f32.mrf.mxu3  ;;  %v113_v40 = vadd.f32 %v270_v24, %v112_v38 }
  0x96   :  { %v190_v41 = vadd.f32 %v271_v25, %v189_v39 }
  0x97   :  { %126 = vst [vmem:[#allocation2 + $0x28] sm:$0xff] %v113_v40 }
  0x98   :  { %203 = vst [vmem:[#allocation4 + $0x28] sm:$0xff] %v190_v41  ;;  %v103_v42 = vpop.f32.mrf.mxu0  ;;  %v180_v43 = vpop.f32.mrf.mxu1 }
  0x99   :  { %v104_v44 = vadd.f32 %v270_v24, %v103_v42  ;;  %v181_v45 = vadd.f32 %v271_v25, %v180_v43 }
  0x9b   :  { %123 = vst [vmem:[#allocation2 + $0x10] sm:$0xff] %v104_v44 }
  0x9c   :  { %v115_v46 = vpop.f32.mrf.mxu2  ;;  %200 = vst [vmem:[#allocation4 + $0x10] sm:$0xff] %v181_v45 }
  0x9d   :  { %v192_v47 = vpop.f32.mrf.mxu3  ;;  %v116_v48 = vadd.f32 %v270_v24, %v115_v46 }
  0x9e   :  { %v193_v49 = vadd.f32 %v271_v25, %v192_v47 }
  0x9f   :  { %127 = vst [vmem:[#allocation2 + $0x30] sm:$0xff] %v116_v48 }
  0xa0   :  { %204 = vst [vmem:[#allocation4 + $0x30] sm:$0xff] %v193_v49  ;;  %v106_v50 = vpop.f32.mrf.mxu0  ;;  %v183_v51 = vpop.f32.mrf.mxu1 }
  0xa1   :  { %v107_v52 = vadd.f32 %v270_v24, %v106_v50  ;;  %v184_v53 = vadd.f32 %v271_v25, %v183_v51 }
  0xa3   :  { %124 = vst [vmem:[#allocation2 + $0x18] sm:$0xff] %v107_v52 }
  0xa4   :  { %v118_v54 = vpop.f32.mrf.mxu2  ;;  %201 = vst [vmem:[#allocation4 + $0x18] sm:$0xff] %v184_v53 }
  0xa5   :  { %v195_v55 = vpop.f32.mrf.mxu3  ;;  %v119_v56 = vadd.f32 %v270_v24, %v118_v54 }
  0xa6   :  { %v196_v57 = vadd.f32 %v271_v25, %v195_v55 }
  0xa7   :  { %128 = vst [vmem:[#allocation2 + $0x38] sm:$0xff] %v119_v56 }
  0xa8   :  { %205 = vst [vmem:[#allocation4 + $0x38] sm:$0xff] %v196_v57  ;;  %218 = dma.vmem_to_hbm [thread:$0]  %s211_s1, 1024, %s213_s26, [#allocation3], %s326_s9, %s326_s9, %s327_s6  }
  0xa9   :  { %231 = dma.vmem_to_hbm [thread:$0]  %s224_s28, 1024, %s226_s8, [#allocation5], %s326_s9, %s326_s9, %s327_s6  }
  0xaa   :  { %320 = dma.done.wait [#allocation3], 1024  }
  0xab   :  { %321 = vsyncadd [#allocation3], 4294966272 }
  0xac   :  { %322 = dma.done.wait [#allocation5], 1024  }
  0xad   :  { %323 = vsyncadd [#allocation5], 4294966272 }
  0xae   :  { %240 = vsyncpa [#allocation3], 1 }
  0xaf   :  { %241 = vsyncpa [#allocation5], 1 }

</bundles_post_ra>
